<compile_context>
chip_gen: v5e
topology: v5e:2x2
jax: 0.10.0
libtpu: 0.0.40
codegen_flags: <defaults>
</compile_context>

<pallas_src>
import jax
import jax.numpy as jnp
from jax.experimental import pallas as pl
from jax.experimental.pallas import tpu as pltpu


# Layer sizes (encoder: 36->18->9->4, decoder: 4->9->18->36)
DIMS = [36, 18, 9, 4, 9, 18, 36]
N_LAYERS = len(DIMS) - 1
F_PAD = DIMS[0]                      # 36: slab feature padding
MAX_TILE_B = 4096                    # lane-tile cap (keeps VMEM ~2-3 MiB)


def _rnd8(d):
    """Round up to a multiple of 8 (sublane), capped at the slab size."""
    return min(F_PAD, ((d + 7) // 8) * 8)


IN_R = [_rnd8(d) for d in DIMS[:-1]]    # [36, 24, 16, 8, 16, 24]
OUT_R = [_rnd8(d) for d in DIMS[1:]]    # [24, 16, 8, 16, 24, 36]
# Invariants: OUT_R[l] == IN_R[l+1]; IN_R[0] == OUT_R[-1] == F_PAD.


def autoencoder_kernel(w_ref, b_ref, x_ref, o_ref):
    """Fused 6x (matmul + bias + tanh), batch on lanes, no padded-row compute.

    w_ref: (6, 36, 36) weight slab, layer l in (out, in) orientation, zero-padded.
           May be bf16 (fast path) or f32.
    b_ref: (6, 36, 1)  f32 bias slab, zero-padded.
    x_ref: (36, TILE_B) f32 activations, batch on the lane axis.
    o_ref: (36, TILE_B) f32 output.
    """
    h = x_ref[...]                                    # (36, TILE_B) f32
    for l in range(N_LAYERS):                         # tiny, fully unrolled
        din, dout = IN_R[l], OUT_R[l]
        # Static, 0-based, 8-aligned slices -> free views; skip padded rows.
        w = w_ref[l, :dout, :din]                     # (dout, din), slab dtype
        b = b_ref[l, :dout, :]                        # (dout, 1) f32
        # (out,in) @ (in,B): N = TILE_B fills the MXU lane axis; f32 accumulate.
        z = jnp.dot(w, h.astype(w.dtype), preferred_element_type=jnp.float32)
        h = jnp.tanh(z + b)                           # bias bcast over lanes; EUP tanh
        # zero-padded rows of w/b keep padded feature rows of h exactly 0
    o_ref[...] = h.astype(o_ref.dtype)                # (36, TILE_B) full-block store


def classical_autoencoder_forward(x, weights, biases, *, tile_b=None,
                                  matmul_dtype=jnp.bfloat16):
    """x: [B, 36] float32. weights[i]: (in_i, out_i). biases[i]: (out_i,).

    Matches torch:  h = tanh(h @ W.T + b)  for each Linear+Tanh pair.
    matmul_dtype=jnp.bfloat16 is the fast MXU path (f32 accumulate, f32 tanh);
    pass jnp.float32 for bit-tight validation.
    """
    B, F = x.shape
    assert F == DIMS[0]
    acc_dtype = jnp.float32

    # ---- balanced batch tiling (review items 3 & 4) ----
    if tile_b is None:
        num_tiles = pl.cdiv(B, MAX_TILE_B)
        if B > 128:
            num_tiles = max(num_tiles, 2)        # >=2 tiles -> both v7x TCs busy
        if num_tiles > 1 and num_tiles % 2 != 0:
            num_tiles += 1                       # even tile count for 2-core split
        tile_b = pl.cdiv(pl.cdiv(B, num_tiles), 128) * 128
    else:
        assert tile_b > 0 and tile_b % 128 == 0, \
            "tile_b must be a positive multiple of 128"
        num_tiles = pl.cdiv(B, tile_b)
    b_pad = num_tiles * tile_b

    # ---- feature-major (batch-on-lanes) activations; pad only if needed ----
    xf = x.astype(acc_dtype)
    if b_pad != B:
        xf = jnp.pad(xf, ((0, b_pad - B), (0, 0)))
    xt = xf.T                                         # (36, b_pad)

    # ---- pack params into two resident, zero-padded slabs ----
    w_slab = jnp.zeros((N_LAYERS, F_PAD, F_PAD), matmul_dtype)
    b_slab = jnp.zeros((N_LAYERS, F_PAD, 1), acc_dtype)
    for l, (w, b) in enumerate(zip(weights, biases)):
        din, dout = w.shape                           # w is (in, out)
        w_slab = w_slab.at[l, :dout, :din].set(w.T.astype(matmul_dtype))  # (out, in)
        b_slab = b_slab.at[l, :dout, 0].set(b.astype(acc_dtype))

    def _call(slab_mode):
        slab_kw = {} if slab_mode is None else {"pipeline_mode": slab_mode}
        return pl.pallas_call(
            autoencoder_kernel,
            out_shape=jax.ShapeDtypeStruct((F_PAD, b_pad), acc_dtype),
            grid=(num_tiles,),
            in_specs=[
                # constant index_map -> slabs DMA'd once, resident across the grid
                pl.BlockSpec((N_LAYERS, F_PAD, F_PAD), lambda i: (0, 0, 0), **slab_kw),
                pl.BlockSpec((N_LAYERS, F_PAD, 1), lambda i: (0, 0, 0), **slab_kw),
                # batch tiles stream through VMEM, double-buffered by Pallas
                pl.BlockSpec((F_PAD, tile_b), lambda i: (0, i)),
            ],
            out_specs=pl.BlockSpec((F_PAD, tile_b), lambda i: (0, i)),
            compiler_params=pltpu.CompilerParams(
                dimension_semantics=("parallel",),   # shard batch across TCs on v7x
            ),
        )(w_slab, b_slab, xt)

    try:
        # Slabs never change -> single-buffer them (review item 5).
        out_t = jax.block_until_ready(_call(pl.Buffered(1)))
    except Exception:
        # pipeline_mode=Buffered(1) unsupported on this jax version; the default
        # double-buffered resident slabs only waste ~60 KiB of VMEM.
        out_t = _call(None)

    # Back to [B, 36] row-major batch layout (drop lane padding).
    return out_t[:DIMS[-1], :B].T


def init_params(key):
    """Deterministic init mirroring torch.nn.Linear shapes.

    torch stores weight as (out, in); we generate in that convention and
    transpose to (in, out) for the reference (x @ W) form.
    """
    weights, biases = [], []
    for i in range(len(DIMS) - 1):
        fan_in, fan_out = DIMS[i], DIMS[i + 1]
        key, kw, kb = jax.random.split(key, 3)
        bound = 1.0 / jnp.sqrt(fan_in)
        w_torch = jax.random.uniform(kw, (fan_out, fan_in), jnp.float32, -bound, bound)
        b = jax.random.uniform(kb, (fan_out,), jnp.float32, -bound, bound)
        weights.append(w_torch.T)  # (in, out)
        biases.append(b)
    return weights, biases


def reference_forward(x, weights, biases):
    """Plain-JAX reference of the same forward pass."""
    h = x
    for w, b in zip(weights, biases):
        h = jnp.tanh(jnp.dot(h, w, preferred_element_type=jnp.float32) + b)
    return h


if __name__ == "__main__":
    key = jax.random.PRNGKey(0)
    key, kx = jax.random.split(key)

    B = 8
    x = jax.random.normal(kx, (B, DIMS[0]), dtype=jnp.float32)
    weights, biases = init_params(key)

    ref = reference_forward(x, weights, biases)

    # f32 validation path (tight tolerance vs reference)
    out_f32 = classical_autoencoder_forward(x, weights, biases,
                                            matmul_dtype=jnp.float32)
    out_f32 = jax.block_until_ready(out_f32)
    assert out_f32.shape == (B, DIMS[-1]), out_f32.shape
    assert jnp.allclose(out_f32, ref, atol=1e-4, rtol=1e-4), "f32 path mismatch"

    # default fast path: bf16 weights/activations on the MXU, f32 accumulate+tanh
    out_bf16 = classical_autoencoder_forward(x, weights, biases)
    out_bf16 = jax.block_until_ready(out_bf16)
    assert out_bf16.shape == (B, DIMS[-1]), out_bf16.shape
    assert jnp.allclose(out_bf16, ref, atol=1e-1), "bf16 path diverged"

    print("KERNEL_OK")
</pallas_src>

<mosaic_0001>
module attributes {stable_mosaic.version = 11 : i64} {
  func.func @autoencoder_kernel(%arg0: i32, %arg1: memref<6x36x36xf32, #tpu.memory_space<vmem>>, %arg2: memref<6x36x1xf32, #tpu.memory_space<vmem>>, %arg3: memref<36x128xf32, #tpu.memory_space<vmem>>, %arg4: memref<36x128xf32, #tpu.memory_space<vmem>>) attributes {dimension_semantics = [#tpu.dimension_semantics<parallel>], iteration_bounds = array<i64: 1>, scalar_prefetch = 0 : i64, scratch_operands = 0 : i64, tpu.core_type = #tpu.core_type<tc>, window_params = [{pipeline_mode = #tpu.pipeline_mode<synchronous>, transform_indices = @transform_0, window_bounds = array<i64: 6, 36, 36>}, {pipeline_mode = #tpu.pipeline_mode<synchronous>, transform_indices = @transform_1, window_bounds = array<i64: 6, 36, 1>}, {transform_indices = @transform_2, window_bounds = array<i64: 36, 128>}, {transform_indices = @transform_3, window_bounds = array<i64: 36, 128>}]} {
    %c0 = arith.constant 0 : index
    %c0_0 = arith.constant 0 : index
    %0 = vector.load %arg3[%c0, %c0_0] : memref<36x128xf32, #tpu.memory_space<vmem>>, vector<36x128xf32>
    %c0_1 = arith.constant 0 : index
    %c0_2 = arith.constant 0 : index
    %c0_3 = arith.constant 0 : index
    %1 = vector.load %arg1[%c0_1, %c0_2, %c0_3] : memref<6x36x36xf32, #tpu.memory_space<vmem>>, vector<1x24x36xf32>
    %2 = vector.shape_cast %1 : vector<1x24x36xf32> to vector<24x36xf32>
    %c0_4 = arith.constant 0 : index
    %c0_5 = arith.constant 0 : index
    %c0_6 = arith.constant 0 : index
    %3 = vector.load %arg2[%c0_4, %c0_5, %c0_6] : memref<6x36x1xf32, #tpu.memory_space<vmem>>, vector<1x24x1xf32>
    %4 = vector.shape_cast %3 : vector<1x24x1xf32> to vector<24x1xf32>
    %cst = arith.constant dense<0.000000e+00> : vector<24x128xf32>
    %5 = tpu.matmul %2, %0, %cst {dimension_numbers = #tpu.dot_dimension_numbers<[1], [0], [0], [1], [0, 0, 1, 1], [], []>} : vector<24x36xf32>, vector<36x128xf32>, vector<24x128xf32> -> vector<24x128xf32>
    %6 = vector.broadcast %4 : vector<24x1xf32> to vector<24x128xf32>
    %7 = arith.addf %5, %6 : vector<24x128xf32>
    %8 = math.tanh %7 : vector<24x128xf32>
    %c1 = arith.constant 1 : index
    %c0_7 = arith.constant 0 : index
    %c0_8 = arith.constant 0 : index
    %9 = vector.load %arg1[%c1, %c0_7, %c0_8] : memref<6x36x36xf32, #tpu.memory_space<vmem>>, vector<1x16x24xf32>
    %10 = vector.shape_cast %9 : vector<1x16x24xf32> to vector<16x24xf32>
    %c1_9 = arith.constant 1 : index
    %c0_10 = arith.constant 0 : index
    %c0_11 = arith.constant 0 : index
    %11 = vector.load %arg2[%c1_9, %c0_10, %c0_11] : memref<6x36x1xf32, #tpu.memory_space<vmem>>, vector<1x16x1xf32>
    %12 = vector.shape_cast %11 : vector<1x16x1xf32> to vector<16x1xf32>
    %cst_12 = arith.constant dense<0.000000e+00> : vector<16x128xf32>
    %13 = tpu.matmul %10, %8, %cst_12 {dimension_numbers = #tpu.dot_dimension_numbers<[1], [0], [0], [1], [0, 0, 1, 1], [], []>} : vector<16x24xf32>, vector<24x128xf32>, vector<16x128xf32> -> vector<16x128xf32>
    %14 = vector.broadcast %12 : vector<16x1xf32> to vector<16x128xf32>
    %15 = arith.addf %13, %14 : vector<16x128xf32>
    %16 = math.tanh %15 : vector<16x128xf32>
    %c2 = arith.constant 2 : index
    %c0_13 = arith.constant 0 : index
    %c0_14 = arith.constant 0 : index
    %17 = vector.load %arg1[%c2, %c0_13, %c0_14] : memref<6x36x36xf32, #tpu.memory_space<vmem>>, vector<1x8x16xf32>
    %18 = vector.shape_cast %17 : vector<1x8x16xf32> to vector<8x16xf32>
    %c2_15 = arith.constant 2 : index
    %c0_16 = arith.constant 0 : index
    %c0_17 = arith.constant 0 : index
    %19 = vector.load %arg2[%c2_15, %c0_16, %c0_17] : memref<6x36x1xf32, #tpu.memory_space<vmem>>, vector<1x8x1xf32>
    %20 = vector.shape_cast %19 : vector<1x8x1xf32> to vector<8x1xf32>
    %cst_18 = arith.constant dense<0.000000e+00> : vector<8x128xf32>
    %21 = tpu.matmul %18, %16, %cst_18 {dimension_numbers = #tpu.dot_dimension_numbers<[1], [0], [0], [1], [0, 0, 1, 1], [], []>} : vector<8x16xf32>, vector<16x128xf32>, vector<8x128xf32> -> vector<8x128xf32>
    %22 = vector.broadcast %20 : vector<8x1xf32> to vector<8x128xf32>
    %23 = arith.addf %21, %22 : vector<8x128xf32>
    %24 = math.tanh %23 : vector<8x128xf32>
    %c3 = arith.constant 3 : index
    %c0_19 = arith.constant 0 : index
    %c0_20 = arith.constant 0 : index
    %25 = vector.load %arg1[%c3, %c0_19, %c0_20] : memref<6x36x36xf32, #tpu.memory_space<vmem>>, vector<1x16x8xf32>
    %26 = vector.shape_cast %25 : vector<1x16x8xf32> to vector<16x8xf32>
    %c3_21 = arith.constant 3 : index
    %c0_22 = arith.constant 0 : index
    %c0_23 = arith.constant 0 : index
    %27 = vector.load %arg2[%c3_21, %c0_22, %c0_23] : memref<6x36x1xf32, #tpu.memory_space<vmem>>, vector<1x16x1xf32>
    %28 = vector.shape_cast %27 : vector<1x16x1xf32> to vector<16x1xf32>
    %cst_24 = arith.constant dense<0.000000e+00> : vector<16x128xf32>
    %29 = tpu.matmul %26, %24, %cst_24 {dimension_numbers = #tpu.dot_dimension_numbers<[1], [0], [0], [1], [0, 0, 1, 1], [], []>} : vector<16x8xf32>, vector<8x128xf32>, vector<16x128xf32> -> vector<16x128xf32>
    %30 = vector.broadcast %28 : vector<16x1xf32> to vector<16x128xf32>
    %31 = arith.addf %29, %30 : vector<16x128xf32>
    %32 = math.tanh %31 : vector<16x128xf32>
    %c4 = arith.constant 4 : index
    %c0_25 = arith.constant 0 : index
    %c0_26 = arith.constant 0 : index
    %33 = vector.load %arg1[%c4, %c0_25, %c0_26] : memref<6x36x36xf32, #tpu.memory_space<vmem>>, vector<1x24x16xf32>
    %34 = vector.shape_cast %33 : vector<1x24x16xf32> to vector<24x16xf32>
    %c4_27 = arith.constant 4 : index
    %c0_28 = arith.constant 0 : index
    %c0_29 = arith.constant 0 : index
    %35 = vector.load %arg2[%c4_27, %c0_28, %c0_29] : memref<6x36x1xf32, #tpu.memory_space<vmem>>, vector<1x24x1xf32>
    %36 = vector.shape_cast %35 : vector<1x24x1xf32> to vector<24x1xf32>
    %cst_30 = arith.constant dense<0.000000e+00> : vector<24x128xf32>
    %37 = tpu.matmul %34, %32, %cst_30 {dimension_numbers = #tpu.dot_dimension_numbers<[1], [0], [0], [1], [0, 0, 1, 1], [], []>} : vector<24x16xf32>, vector<16x128xf32>, vector<24x128xf32> -> vector<24x128xf32>
    %38 = vector.broadcast %36 : vector<24x1xf32> to vector<24x128xf32>
    %39 = arith.addf %37, %38 : vector<24x128xf32>
    %40 = math.tanh %39 : vector<24x128xf32>
    %c5 = arith.constant 5 : index
    %c0_31 = arith.constant 0 : index
    %c0_32 = arith.constant 0 : index
    %41 = vector.load %arg1[%c5, %c0_31, %c0_32] : memref<6x36x36xf32, #tpu.memory_space<vmem>>, vector<1x36x24xf32>
    %42 = vector.shape_cast %41 : vector<1x36x24xf32> to vector<36x24xf32>
    %c5_33 = arith.constant 5 : index
    %c0_34 = arith.constant 0 : index
    %c0_35 = arith.constant 0 : index
    %43 = vector.load %arg2[%c5_33, %c0_34, %c0_35] : memref<6x36x1xf32, #tpu.memory_space<vmem>>, vector<1x36x1xf32>
    %44 = vector.shape_cast %43 : vector<1x36x1xf32> to vector<36x1xf32>
    %cst_36 = arith.constant dense<0.000000e+00> : vector<36x128xf32>
    %45 = tpu.matmul %42, %40, %cst_36 {dimension_numbers = #tpu.dot_dimension_numbers<[1], [0], [0], [1], [0, 0, 1, 1], [], []>} : vector<36x24xf32>, vector<24x128xf32>, vector<36x128xf32> -> vector<36x128xf32>
    %46 = vector.broadcast %44 : vector<36x1xf32> to vector<36x128xf32>
    %47 = arith.addf %45, %46 : vector<36x128xf32>
    %48 = math.tanh %47 : vector<36x128xf32>
    %c0_37 = arith.constant 0 : index
    %c0_38 = arith.constant 0 : index
    %49 = vector.load %arg4[%c0_37, %c0_38] : memref<36x128xf32, #tpu.memory_space<vmem>>, vector<36x128xf32>
    tpu.vector_store %arg4[%c0_37, %c0_38], %48 {strides = array<i32>} : memref<36x128xf32, #tpu.memory_space<vmem>>, vector<36x128xf32>,
    return
  }
  func.func @transform_0(%arg0: i32) -> (i32, i32, i32) {
    %c0_i32 = arith.constant 0 : i32
    %c0_i32_0 = arith.constant 0 : i32
    %c0_i32_1 = arith.constant 0 : i32
    %c0_i32_2 = arith.constant 0 : i32
    return %c0_i32, %c0_i32_0, %c0_i32_1 : i32, i32, i32
  }
  func.func @transform_1(%arg0: i32) -> (i32, i32, i32) {
    %c0_i32 = arith.constant 0 : i32
    %c0_i32_0 = arith.constant 0 : i32
    %c0_i32_1 = arith.constant 0 : i32
    %c0_i32_2 = arith.constant 0 : i32
    return %c0_i32, %c0_i32_0, %c0_i32_1 : i32, i32, i32
  }
  func.func @transform_2(%arg0: i32) -> (i32, i32) {
    %c0_i32 = arith.constant 0 : i32
    %c0_i32_0 = arith.constant 0 : i32
    return %c0_i32, %arg0 : i32, i32
  }
  func.func @transform_3(%arg0: i32) -> (i32, i32) {
    %c0_i32 = arith.constant 0 : i32
    %c0_i32_0 = arith.constant 0 : i32
    return %c0_i32, %arg0 : i32, i32
  }
}

module attributes {stable_mosaic.version = 11 : i64} {
  func.func @autoencoder_kernel(%arg0: i32, %arg1: memref<6x36x36xf32, #tpu.memory_space<vmem>>, %arg2: memref<6x36x1xf32, #tpu.memory_space<vmem>>, %arg3: memref<36x128xf32, #tpu.memory_space<vmem>>, %arg4: memref<36x128xf32, #tpu.memory_space<vmem>>) attributes {dimension_semantics = [#tpu.dimension_semantics<parallel>], iteration_bounds = array<i64: 1>, scalar_prefetch = 0 : i64, scratch_operands = 0 : i64, tpu.core_type = #tpu.core_type<tc>, window_params = [{pipeline_mode = #tpu.pipeline_mode<synchronous>, transform_indices = @transform_0, window_bounds = array<i64: 6, 36, 36>}, {pipeline_mode = #tpu.pipeline_mode<synchronous>, transform_indices = @transform_1, window_bounds = array<i64: 6, 36, 1>}, {transform_indices = @transform_2, window_bounds = array<i64: 36, 128>}, {transform_indices = @transform_3, window_bounds = array<i64: 36, 128>}]} {
    %c0 = arith.constant 0 : index
    %c0_0 = arith.constant 0 : index
    %0 = vector.load %arg3[%c0, %c0_0] : memref<36x128xf32, #tpu.memory_space<vmem>>, vector<36x128xf32>
    %c0_1 = arith.constant 0 : index
    %c0_2 = arith.constant 0 : index
    %c0_3 = arith.constant 0 : index
    %1 = vector.load %arg1[%c0_1, %c0_2, %c0_3] : memref<6x36x36xf32, #tpu.memory_space<vmem>>, vector<1x24x36xf32>
    %2 = vector.shape_cast %1 : vector<1x24x36xf32> to vector<24x36xf32>
    %c0_4 = arith.constant 0 : index
    %c0_5 = arith.constant 0 : index
    %c0_6 = arith.constant 0 : index
    %3 = vector.load %arg2[%c0_4, %c0_5, %c0_6] : memref<6x36x1xf32, #tpu.memory_space<vmem>>, vector<1x24x1xf32>
    %4 = vector.shape_cast %3 : vector<1x24x1xf32> to vector<24x1xf32>
    %cst = arith.constant dense<0.000000e+00> : vector<24x128xf32>
    %5 = tpu.matmul %2, %0, %cst {dimension_numbers = #tpu.dot_dimension_numbers<[1], [0], [0], [1], [0, 0, 1, 1], [], []>} : vector<24x36xf32>, vector<36x128xf32>, vector<24x128xf32> -> vector<24x128xf32>
    %6 = vector.broadcast %4 : vector<24x1xf32> to vector<24x128xf32>
    %7 = arith.addf %5, %6 : vector<24x128xf32>
    %8 = math.tanh %7 : vector<24x128xf32>
    %c1 = arith.constant 1 : index
    %c0_7 = arith.constant 0 : index
    %c0_8 = arith.constant 0 : index
    %9 = vector.load %arg1[%c1, %c0_7, %c0_8] : memref<6x36x36xf32, #tpu.memory_space<vmem>>, vector<1x16x24xf32>
    %10 = vector.shape_cast %9 : vector<1x16x24xf32> to vector<16x24xf32>
    %c1_9 = arith.constant 1 : index
    %c0_10 = arith.constant 0 : index
    %c0_11 = arith.constant 0 : index
    %11 = vector.load %arg2[%c1_9, %c0_10, %c0_11] : memref<6x36x1xf32, #tpu.memory_space<vmem>>, vector<1x16x1xf32>
    %12 = vector.shape_cast %11 : vector<1x16x1xf32> to vector<16x1xf32>
    %cst_12 = arith.constant dense<0.000000e+00> : vector<16x128xf32>
    %13 = tpu.matmul %10, %8, %cst_12 {dimension_numbers = #tpu.dot_dimension_numbers<[1], [0], [0], [1], [0, 0, 1, 1], [], []>} : vector<16x24xf32>, vector<24x128xf32>, vector<16x128xf32> -> vector<16x128xf32>
    %14 = vector.broadcast %12 : vector<16x1xf32> to vector<16x128xf32>
    %15 = arith.addf %13, %14 : vector<16x128xf32>
    %16 = math.tanh %15 : vector<16x128xf32>
    %c2 = arith.constant 2 : index
    %c0_13 = arith.constant 0 : index
    %c0_14 = arith.constant 0 : index
    %17 = vector.load %arg1[%c2, %c0_13, %c0_14] : memref<6x36x36xf32, #tpu.memory_space<vmem>>, vector<1x8x16xf32>
    %18 = vector.shape_cast %17 : vector<1x8x16xf32> to vector<8x16xf32>
    %c2_15 = arith.constant 2 : index
    %c0_16 = arith.constant 0 : index
    %c0_17 = arith.constant 0 : index
    %19 = vector.load %arg2[%c2_15, %c0_16, %c0_17] : memref<6x36x1xf32, #tpu.memory_space<vmem>>, vector<1x8x1xf32>
    %20 = vector.shape_cast %19 : vector<1x8x1xf32> to vector<8x1xf32>
    %cst_18 = arith.constant dense<0.000000e+00> : vector<8x128xf32>
    %21 = tpu.matmul %18, %16, %cst_18 {dimension_numbers = #tpu.dot_dimension_numbers<[1], [0], [0], [1], [0, 0, 1, 1], [], []>} : vector<8x16xf32>, vector<16x128xf32>, vector<8x128xf32> -> vector<8x128xf32>
    %22 = vector.broadcast %20 : vector<8x1xf32> to vector<8x128xf32>
    %23 = arith.addf %21, %22 : vector<8x128xf32>
    %24 = math.tanh %23 : vector<8x128xf32>
    %c3 = arith.constant 3 : index
    %c0_19 = arith.constant 0 : index
    %c0_20 = arith.constant 0 : index
    %25 = vector.load %arg1[%c3, %c0_19, %c0_20] : memref<6x36x36xf32, #tpu.memory_space<vmem>>, vector<1x16x8xf32>
    %26 = vector.shape_cast %25 : vector<1x16x8xf32> to vector<16x8xf32>
    %c3_21 = arith.constant 3 : index
    %c0_22 = arith.constant 0 : index
    %c0_23 = arith.constant 0 : index
    %27 = vector.load %arg2[%c3_21, %c0_22, %c0_23] : memref<6x36x1xf32, #tpu.memory_space<vmem>>, vector<1x16x1xf32>
    %28 = vector.shape_cast %27 : vector<1x16x1xf32> to vector<16x1xf32>
    %cst_24 = arith.constant dense<0.000000e+00> : vector<16x128xf32>
    %29 = tpu.matmul %26, %24, %cst_24 {dimension_numbers = #tpu.dot_dimension_numbers<[1], [0], [0], [1], [0, 0, 1, 1], [], []>} : vector<16x8xf32>, vector<8x128xf32>, vector<16x128xf32> -> vector<16x128xf32>
    %30 = vector.broadcast %28 : vector<16x1xf32> to vector<16x128xf32>
    %31 = arith.addf %29, %30 : vector<16x128xf32>
    %32 = math.tanh %31 : vector<16x128xf32>
    %c4 = arith.constant 4 : index
    %c0_25 = arith.constant 0 : index
    %c0_26 = arith.constant 0 : index
    %33 = vector.load %arg1[%c4, %c0_25, %c0_26] : memref<6x36x36xf32, #tpu.memory_space<vmem>>, vector<1x24x16xf32>
    %34 = vector.shape_cast %33 : vector<1x24x16xf32> to vector<24x16xf32>
    %c4_27 = arith.constant 4 : index
    %c0_28 = arith.constant 0 : index
    %c0_29 = arith.constant 0 : index
    %35 = vector.load %arg2[%c4_27, %c0_28, %c0_29] : memref<6x36x1xf32, #tpu.memory_space<vmem>>, vector<1x24x1xf32>
    %36 = vector.shape_cast %35 : vector<1x24x1xf32> to vector<24x1xf32>
    %cst_30 = arith.constant dense<0.000000e+00> : vector<24x128xf32>
    %37 = tpu.matmul %34, %32, %cst_30 {dimension_numbers = #tpu.dot_dimension_numbers<[1], [0], [0], [1], [0, 0, 1, 1], [], []>} : vector<24x16xf32>, vector<16x128xf32>, vector<24x128xf32> -> vector<24x128xf32>
    %38 = vector.broadcast %36 : vector<24x1xf32> to vector<24x128xf32>
    %39 = arith.addf %37, %38 : vector<24x128xf32>
    %40 = math.tanh %39 : vector<24x128xf32>
    %c5 = arith.constant 5 : index
    %c0_31 = arith.constant 0 : index
    %c0_32 = arith.constant 0 : index
    %41 = vector.load %arg1[%c5, %c0_31, %c0_32] : memref<6x36x36xf32, #tpu.memory_space<vmem>>, vector<1x36x24xf32>
    %42 = vector.shape_cast %41 : vector<1x36x24xf32> to vector<36x24xf32>
    %c5_33 = arith.constant 5 : index
    %c0_34 = arith.constant 0 : index
    %c0_35 = arith.constant 0 : index
    %43 = vector.load %arg2[%c5_33, %c0_34, %c0_35] : memref<6x36x1xf32, #tpu.memory_space<vmem>>, vector<1x36x1xf32>
    %44 = vector.shape_cast %43 : vector<1x36x1xf32> to vector<36x1xf32>
    %cst_36 = arith.constant dense<0.000000e+00> : vector<36x128xf32>
    %45 = tpu.matmul %42, %40, %cst_36 {dimension_numbers = #tpu.dot_dimension_numbers<[1], [0], [0], [1], [0, 0, 1, 1], [], []>} : vector<36x24xf32>, vector<24x128xf32>, vector<36x128xf32> -> vector<36x128xf32>
    %46 = vector.broadcast %44 : vector<36x1xf32> to vector<36x128xf32>
    %47 = arith.addf %45, %46 : vector<36x128xf32>
    %48 = math.tanh %47 : vector<36x128xf32>
    %c0_37 = arith.constant 0 : index
    %c0_38 = arith.constant 0 : index
    %49 = vector.load %arg4[%c0_37, %c0_38] : memref<36x128xf32, #tpu.memory_space<vmem>>, vector<36x128xf32>
    tpu.vector_store %arg4[%c0_37, %c0_38], %48 {strides = array<i32>} : memref<36x128xf32, #tpu.memory_space<vmem>>, vector<36x128xf32>,
    return
  }
  func.func @transform_0(%arg0: i32) -> (i32, i32, i32) {
    %c0_i32 = arith.constant 0 : i32
    %c0_i32_0 = arith.constant 0 : i32
    %c0_i32_1 = arith.constant 0 : i32
    %c0_i32_2 = arith.constant 0 : i32
    return %c0_i32, %c0_i32_0, %c0_i32_1 : i32, i32, i32
  }
  func.func @transform_1(%arg0: i32) -> (i32, i32, i32) {
    %c0_i32 = arith.constant 0 : i32
    %c0_i32_0 = arith.constant 0 : i32
    %c0_i32_1 = arith.constant 0 : i32
    %c0_i32_2 = arith.constant 0 : i32
    return %c0_i32, %c0_i32_0, %c0_i32_1 : i32, i32, i32
  }
  func.func @transform_2(%arg0: i32) -> (i32, i32) {
    %c0_i32 = arith.constant 0 : i32
    %c0_i32_0 = arith.constant 0 : i32
    return %c0_i32, %arg0 : i32, i32
  }
  func.func @transform_3(%arg0: i32) -> (i32, i32) {
    %c0_i32 = arith.constant 0 : i32
    %c0_i32_0 = arith.constant 0 : i32
    return %c0_i32, %arg0 : i32, i32
  }
}

</mosaic_0001>

<bundles_post_ra>
// kernel: tpu_custom_call.1
= control target key start
LH: loop header
LB: loop body
LE: loop exit
PB: predicated region body
PF: predicated region fallthrough
CT: control target
= control target key end

     0   :  { %8 = vsyncpa [#allocation3], 0  ;;  %s689_s0 = inlined_call_operand.vmem [shape: f32[6,36,36], index: 0, kind: input, shape index: {}]   ;;  %s690_s1 = inlined_call_operand.vmem [shape: f32[6,36,1], index: 1, kind: input, shape index: {}]   ;;  %s691_s2 = inlined_call_operand.hbm [shape: f32[36,128], index: 2, kind: input, shape index: {}]   ;;  %s692_s3 = inlined_call_operand.hbm [shape: f32[36,128], index: 3, kind: output, shape index: {}]  }
   0x1   :  { %9 = vsyncpa [#allocation4], 0  ;;  %s18_s14 = sshll.u32 %s691_s2, 4  ;;  %s542_s15 = smov [#allocation2]   ;;  %s19_s14 = int_to_ptr.hbm [resolvable:$true] %s18_s14 }
   0x2   :  { %s20_s16 = sshll.u32 %s542_s15, 4  ;;  %s543_s17 = smov 128   ;;  %s21_s16 = int_to_ptr.vmem [resolvable:$true] %s20_s16 }
   0x3   :  { %s544_s18 = smov 8  }
   0x4   :  { %26 = dma.hbm_to_vmem [thread:$0]  %s19_s14, 640, %s21_s16, [#allocation3], %s543_s17, %s543_s17, %s544_s18  }
   0x5   :  { %538 = dma.done.wait [#allocation3], 640  }
   0x6   :  { %539 = vsyncadd [#allocation3], 4294966656  ;;  %v545_v0 = vmov 0   ;;  %vm67_vm0 = vcmask 1043456   ;;  %v41_v1 = vld [vmem:[%s690_s1 + $0x10] sm:$0xff]  ;;  %v34_v3 = vld [vmem:[#allocation2 + $0x18] sm:$0xff] }
   0x7   :  { %455 = vset.pattern.permute.xlu0 %v545_v0  ;;  %456 = vset.pattern.permute.xlu1 %v545_v0  ;;  %v35_v2 = vld [vmem:[#allocation2 + $0x20] sm:$0xf]  ;;  %v33_v4 = vld [vmem:[#allocation2 + $0x10] sm:$0xff]  ;;  %v32_v6 = vld [vmem:[#allocation2 + $0x8] sm:$0xff]  ;;  %vm57_vm1 = vcmask 293888   ;;  %vm116_vm2 = vcmask 195584  }
   0x8   :  { %457 = vset.pattern.permute.xlu2 %v545_v0  ;;  %54 = vperm.xlu0 %455, %v41_v1   ;;  %v39_v5 = vld [vmem:[%s690_s1] sm:$0xff]  ;;  %v40_v7 = vld [vmem:[%s690_s1 + $0x8] sm:$0xff]  ;;  %v411_v10 = vld [vmem:[%s690_s1 + $0x30] sm:$0xff]  ;;  %vm157_vm3 = vcmask 130048   ;;  %vm198_vm4 = vcmask 64512   ;;  %s391_s5 = sshll.u32 %s692_s3, 4  ;;  %s392_s5 = int_to_ptr.hbm [resolvable:$true] %s391_s5 }
   0x9   :  { %404 = vmatpush.msk.msra.mxu0 %vm67_vm0, %v35_v2  ;;  %44 = vperm.xlu1 %456, %v39_v5   ;;  %v31_v8 = vld [vmem:[#allocation2] sm:$0xff]  ;;  %v37_v12 = vld [vmem:[%s689_s0 + $0x8] sm:$0xff]  ;;  %v419_v13 = vld [vmem:[%s690_s1 + $0x78] sm:$0xff] }
   0xa   :  { %v36_v9 = vld [vmem:[%s689_s0] sm:$0xff]  ;;  %v427_v14 = vld [vmem:[%s690_s1 + $0xa8] sm:$0xff]  ;;  %v38_v15 = vld [vmem:[%s689_s0 + $0x10] sm:$0xff] }
   0xb   :  { %83 = vmatpush.msra.mxu0 %v34_v3  ;;  %v420_v11 = vld [vmem:[%s690_s1 + $0x80] sm:$0xff]  ;;  %v438_v17 = vld [vmem:[%s690_s1 + $0xd0] sm:$0xff]  ;;  %v439_v18 = vld [vmem:[%s690_s1 + $0xd8] sm:$0xff] }
   0xc   :  { %v426_v16 = vld [vmem:[%s690_s1 + $0xa0] sm:$0xff]  ;;  %v441_v19 = vld [vmem:[%s690_s1 + $0xe8] sm:$0xf]  ;;  %v415_v24 = vld [vmem:[%s690_s1 + $0x50] sm:$0xff] }
   0xd   :  { %84 = vmatpush.msra.mxu0 %v33_v4  ;;  %v410_v22 = vld [vmem:[%s690_s1 + $0x28] sm:$0xff]  ;;  %v428_v31 = vld [vmem:[%s690_s1 + $0xb0] sm:$0xff]  ;;  %v440_v38 = vld [vmem:[%s690_s1 + $0xe0] sm:$0xff] }
   0xe   :  { %108 = vperm.xlu2 %457, %v410_v22   ;;  %v408_v34 = vld [vmem:[%s689_s0 + $0x28] sm:$0xff]  ;;  %v409_v37 = vld [vmem:[%s689_s0 + $0x30] sm:$0xff]  ;;  %v417_v51 = vld [vmem:[%s689_s0 + $0x78] sm:$0xff] }
   0xf   :  { %85 = vmatpush.msra.mxu0 %v32_v6  ;;  %v437_v36 = vld [vmem:[%s690_s1 + $0xc8] sm:$0xff]  ;;  %v414_v46 = vld [vmem:[%s689_s0 + $0x50] sm:$0xff]  ;;  %v418_v53 = vld [vmem:[%s689_s0 + $0x80] sm:$0xff] }
  0x10   :  { %49 = vperm.xlu0 %455, %v40_v7   ;;  %v423_v61 = vld [vmem:[%s689_s0 + $0xa0] sm:$0xff]  ;;  %v424_v63 = vld [vmem:[%s689_s0 + $0xa8] sm:$0xff]  ;;  %v425_v0 = vld [vmem:[%s689_s0 + $0xb0] sm:$0xff] }
  0x11   :  { %86 = vmatpush.msra.mxu0 %v31_v8  ;;  %113 = vperm.xlu1 %456, %v411_v10  }
  0x12   :  { %405 = vmatmul.msk.f32.vlgmr.msra.gmra.mxu0 %vm57_vm1, %v36_v9 }
  0x16   :  { %154 = vperm.xlu2 %457, %v415_v24  }
  0x18   :  { %195 = vperm.xlu0 %455, %v420_v11  }
  0x19   :  { %190 = vperm.xlu1 %456, %v419_v13   ;;  %v434_v13 = vld [vmem:[%s689_s0 + $0xd8] sm:$0xff] }
  0x1a   :  { %406 = vmatmul.msk.f32.gmra.mxu0 %vm57_vm1, %v37_v12  ;;  %v432_v12 = vld [vmem:[%s689_s0 + $0xc8] sm:$0xff] }
  0x1e   :  { %250 = vperm.xlu2 %457, %v428_v31  }
  0x20   :  { %245 = vperm.xlu0 %455, %v427_v14  }
  0x21   :  { %240 = vperm.xlu1 %456, %v426_v16   ;;  %v435_v16 = vld [vmem:[%s689_s0 + $0xe0] sm:$0xff] }
  0x22   :  { %407 = vmatmul.msk.f32.gmra.mxu0 %vm57_vm1, %v38_v15  ;;  %v433_v15 = vld [vmem:[%s689_s0 + $0xd0] sm:$0xff] }
  0x26   :  { %305 = vperm.xlu2 %457, %v437_v36  }
  0x28   :  { %310 = vperm.xlu0 %455, %v438_v17   ;;  %v436_v17 = vld [vmem:[%s689_s0 + $0xe8] sm:$0xf]  ;;  %s546_s0 = smov [#allocation5]  }
  0x29   :  { %315 = vperm.xlu1 %456, %v439_v18   ;;  %s389_s29 = sshll.u32 %s546_s0, 4  ;;  %s390_s29 = int_to_ptr.vmem [resolvable:$true] %s389_s29 }
  0x2e   :  { %320 = vperm.xlu2 %457, %v440_v38  }
  0x30   :  { %325 = vperm.xlu0 %455, %v441_v19  }
  0x68   :  { %v109_v41 = vpop.permute.xlu2 %108 }
  0x70   :  { %v155_v48 = vpop.permute.xlu2 %154 }
  0x78   :  { %v251_v4 = vpop.permute.xlu2 %250 }
  0x7a   :  { %v55_v21 = vpop.permute.xlu0 %54 }
  0x7b   :  { %v45_v29 = vpop.permute.xlu1 %44 }
  0x80   :  { %v306_v18 = vpop.permute.xlu2 %305 }
  0x82   :  { %v50_v25 = vpop.permute.xlu0 %49 }
  0x83   :  { %v114_v40 = vpop.permute.xlu1 %113 }
  0x8a   :  { %v196_v55 = vpop.permute.xlu0 %195 }
  0x8b   :  { %v191_v56 = vpop.permute.xlu1 %190 }
  0x8f   :  { %v88_v20 = vpop.f32.mrf.mxu0 }
  0x90   :  { %v89_v30 = vadd.f32 %v88_v20, %v45_v29 }
  0x92   :  { %v246_v3 = vpop.permute.xlu0 %245 }
  0x93   :  { %v241_v8 = vpop.permute.xlu1 %240 }
  0x97   :  { %v91_v23 = vpop.f32.mrf.mxu0 }
  0x98   :  { %v92_v27 = vadd.f32 %v91_v23, %v50_v25 }
  0x9a   :  { %v311_v24 = vpop.permute.xlu0 %310 }
  0x9f   :  { %v94_v26 = vpop.f32.mrf.mxu0 }
  0xa0   :  { %v95_v28 = vadd.f32 %v94_v26, %v55_v21  ;;  %v316_v21 = vpop.permute.xlu1 %315 }
  0xa2   :  { %458 = vtanh.f32 %v95_v28  ;;  %v321_v28 = vpop.permute.xlu2 %320 }
  0xa3   :  { %460 = vtanh.f32 %v92_v27 }
  0xa4   :  { %462 = vtanh.f32 %v89_v30 }
  0xa8   :  { %v459_v32 = vpop.eup %458 }
  0xa9   :  { %136 = vmatpush.msra.mxu1 %v459_v32  ;;  %v461_v33 = vpop.eup %460 }
  0xaa   :  { %v463_v35 = vpop.eup %462 }
  0xab   :  { %137 = vmatpush.msra.mxu1 %v461_v33  ;;  %v326_v33 = vpop.permute.xlu0 %325 }
  0xad   :  { %138 = vmatpush.msra.mxu1 %v463_v35 }
  0xae   :  { %412 = vmatmul.msk.f32.vlgmr.msra.gmra.mxu1 %vm116_vm2, %v408_v34 }
  0xb6   :  { %413 = vmatmul.msk.f32.gmra.mxu1 %vm116_vm2, %v409_v37 }
 0x12b   :  { %v140_v39 = vpop.f32.mrf.mxu1 }
 0x12c   :  { %v141_v43 = vadd.f32 %v140_v39, %v109_v41 }
 0x133   :  { %v143_v42 = vpop.f32.mrf.mxu1 }
 0x134   :  { %v144_v44 = vadd.f32 %v143_v42, %v114_v40 }
 0x136   :  { %464 = vtanh.f32 %v144_v44 }
 0x137   :  { %466 = vtanh.f32 %v141_v43 }
 0x13c   :  { %v465_v45 = vpop.eup %464 }
 0x13d   :  { %175 = vmatpush.msra.mxu2 %v465_v45  ;;  %v467_v47 = vpop.eup %466 }
 0x13f   :  { %176 = vmatpush.msra.mxu2 %v467_v47 }
 0x140   :  { %416 = vmatmul.msk.f32.vlgmr.msra.gmra.mxu2 %vm157_vm3, %v414_v46 }
 0x1c3   :  { %v178_v49 = vpop.f32.mrf.mxu2 }
 0x1c4   :  { %v179_v50 = vadd.f32 %v178_v49, %v155_v48 }
 0x1c6   :  { %468 = vtanh.f32 %v179_v50 }
 0x1cc   :  { %v469_v52 = vpop.eup %468 }
 0x1cd   :  { %220 = vmatpush.msra.mxu3 %v469_v52 }
 0x1ce   :  { %421 = vmatmul.msk.f32.vlgmr.msra.gmra.mxu3 %vm198_vm4, %v417_v51 }
 0x1d6   :  { %422 = vmatmul.msk.f32.gmra.mxu3 %vm198_vm4, %v418_v53 }
 0x251   :  { %v222_v54 = vpop.f32.mrf.mxu3 }
 0x252   :  { %v223_v58 = vadd.f32 %v222_v54, %v191_v56 }
 0x259   :  { %v225_v57 = vpop.f32.mrf.mxu3 }
 0x25a   :  { %v226_v59 = vadd.f32 %v225_v57, %v196_v55 }
 0x25c   :  { %470 = vtanh.f32 %v226_v59 }
 0x25d   :  { %472 = vtanh.f32 %v223_v58 }
 0x262   :  { %v471_v60 = vpop.eup %470 }
 0x263   :  { %276 = vmatpush.msrb.mxu2 %v471_v60  ;;  %v473_v62 = vpop.eup %472 }
 0x265   :  { %277 = vmatpush.msrb.mxu2 %v473_v62 }
 0x266   :  { %429 = vmatmul.msk.f32.vlgmr.msrb.gmra.mxu2 %vm157_vm3, %v423_v61 }
 0x26e   :  { %430 = vmatmul.msk.f32.gmra.mxu2 %vm157_vm3, %v424_v63 }
 0x276   :  { %431 = vmatmul.msk.f32.gmra.mxu2 %vm157_vm3, %v425_v0 }
 0x2e9   :  { %v279_v1 = vpop.f32.mrf.mxu2 }
 0x2ea   :  { %v280_v9 = vadd.f32 %v279_v1, %v241_v8 }
 0x2f1   :  { %v282_v2 = vpop.f32.mrf.mxu2 }
 0x2f2   :  { %v283_v6 = vadd.f32 %v282_v2, %v246_v3 }
 0x2f9   :  { %v285_v5 = vpop.f32.mrf.mxu2 }
 0x2fa   :  { %v286_v7 = vadd.f32 %v285_v5, %v251_v4 }
 0x2fc   :  { %474 = vtanh.f32 %v286_v7 }
 0x2fd   :  { %476 = vtanh.f32 %v283_v6 }
 0x2fe   :  { %478 = vtanh.f32 %v280_v9 }
 0x302   :  { %v475_v10 = vpop.eup %474 }
 0x303   :  { %356 = vmatpush.msrb.mxu1 %v475_v10  ;;  %447 = vmatpush.msrb.mxu3 %v475_v10  ;;  %v477_v11 = vpop.eup %476 }
 0x304   :  { %v479_v14 = vpop.eup %478 }
 0x305   :  { %357 = vmatpush.msrb.mxu1 %v477_v11  ;;  %448 = vmatpush.msrb.mxu3 %v477_v11 }
 0x307   :  { %358 = vmatpush.msrb.mxu1 %v479_v14  ;;  %449 = vmatpush.msrb.mxu3 %v479_v14 }
 0x308   :  { %442 = vmatmul.msk.f32.vlgmr.msrb.gmra.mxu1 %vm116_vm2, %v432_v12  ;;  %444 = vmatmul.msk.f32.vlgmr.msrb.gmra.mxu3 %vm116_vm2, %v434_v13 }
 0x310   :  { %443 = vmatmul.msk.f32.gmra.mxu1 %vm116_vm2, %v433_v15  ;;  %445 = vmatmul.msk.f32.gmra.mxu3 %vm116_vm2, %v435_v16 }
 0x318   :  { %446 = vmatmul.msk.f32.gmra.mxu3 %vm116_vm2, %v436_v17 }
 0x385   :  { %v360_v19 = vpop.f32.mrf.mxu1 }
 0x386   :  { %v361_v20 = vadd.f32 %v360_v19, %v306_v18 }
 0x388   :  { %480 = vtanh.f32 %v361_v20 }
 0x38b   :  { %v366_v22 = vpop.f32.mrf.mxu3 }
 0x38c   :  { %v367_v23 = vadd.f32 %v366_v22, %v316_v21 }
 0x38d   :  { %v363_v25 = vpop.f32.mrf.mxu1 }
 0x38e   :  { %v481_v26 = vpop.eup %480  ;;  %482 = vtanh.f32 %v367_v23  ;;  %v364_v27 = vadd.f32 %v363_v25, %v311_v24 }
 0x38f   :  { %380 = vst [vmem:[#allocation5] sm:$0xff] %v481_v26 }
 0x390   :  { %484 = vtanh.f32 %v364_v27 }
 0x393   :  { %v369_v29 = vpop.f32.mrf.mxu3 }
 0x394   :  { %v483_v30 = vpop.eup %482  ;;  %v370_v31 = vadd.f32 %v369_v29, %v321_v28 }
 0x395   :  { %382 = vst [vmem:[#allocation5 + $0x10] sm:$0xff] %v483_v30 }
 0x396   :  { %v485_v32 = vpop.eup %484  ;;  %486 = vtanh.f32 %v370_v31 }
 0x397   :  { %381 = vst [vmem:[#allocation5 + $0x8] sm:$0xff] %v485_v32 }
 0x39b   :  { %v372_v34 = vpop.f32.mrf.mxu3 }
 0x39c   :  { %v487_v35 = vpop.eup %486  ;;  %v373_v36 = vadd.f32 %v372_v34, %v326_v33 }
 0x39d   :  { %383 = vst [vmem:[#allocation5 + $0x18] sm:$0xff] %v487_v35 }
 0x39e   :  { %488 = vtanh.f32 %v373_v36 }
 0x3a4   :  { %v489_v37 = vpop.eup %488 }
 0x3a5   :  { %384 = vst [vmem:[#allocation5 + $0x20] sm:$0xf] %v489_v37 }
 0x3a6   :  { %397 = dma.vmem_to_hbm [thread:$0]  %s390_s29, 640, %s392_s5, [#allocation4], %s543_s17, %s543_s17, %s544_s18  }
 0x3a7   :  { %540 = dma.done.wait [#allocation4], 640  }
 0x3a8   :  { %541 = vsyncadd [#allocation4], 4294966656 }
 0x3a9   :  { %402 = vsyncpa [#allocation3], 1 }
 0x3aa   :  { %403 = vsyncpa [#allocation4], 1 }

// kernel: tpu_custom_call.1
= control target key start
LH: loop header
LB: loop body
LE: loop exit
PB: predicated region body
PF: predicated region fallthrough
CT: control target
= control target key end

     0   :  { %8 = vsyncpa [#allocation3], 0  ;;  %s689_s0 = inlined_call_operand.vmem [shape: f32[6,36,36], index: 0, kind: input, shape index: {}]   ;;  %s690_s1 = inlined_call_operand.vmem [shape: f32[6,36,1], index: 1, kind: input, shape index: {}]   ;;  %s691_s2 = inlined_call_operand.hbm [shape: f32[36,128], index: 2, kind: input, shape index: {}]   ;;  %s692_s3 = inlined_call_operand.hbm [shape: f32[36,128], index: 3, kind: output, shape index: {}]  }
   0x1   :  { %9 = vsyncpa [#allocation4], 0  ;;  %s18_s14 = sshll.u32 %s691_s2, 4  ;;  %s542_s15 = smov [#allocation2]   ;;  %s19_s14 = int_to_ptr.hbm [resolvable:$true] %s18_s14 }
   0x2   :  { %s20_s16 = sshll.u32 %s542_s15, 4  ;;  %s543_s17 = smov 128   ;;  %s21_s16 = int_to_ptr.vmem [resolvable:$true] %s20_s16 }
   0x3   :  { %s544_s18 = smov 8  }
   0x4   :  { %26 = dma.hbm_to_vmem [thread:$0]  %s19_s14, 640, %s21_s16, [#allocation3], %s543_s17, %s543_s17, %s544_s18  }
   0x5   :  { %538 = dma.done.wait [#allocation3], 640  }
   0x6   :  { %539 = vsyncadd [#allocation3], 4294966656  ;;  %v545_v0 = vmov 0   ;;  %vm67_vm0 = vcmask 1043456   ;;  %v41_v1 = vld [vmem:[%s690_s1 + $0x10] sm:$0xff]  ;;  %v34_v3 = vld [vmem:[#allocation2 + $0x18] sm:$0xff] }
   0x7   :  { %455 = vset.pattern.permute.xlu0 %v545_v0  ;;  %456 = vset.pattern.permute.xlu1 %v545_v0  ;;  %v35_v2 = vld [vmem:[#allocation2 + $0x20] sm:$0xf]  ;;  %v33_v4 = vld [vmem:[#allocation2 + $0x10] sm:$0xff]  ;;  %v32_v6 = vld [vmem:[#allocation2 + $0x8] sm:$0xff]  ;;  %vm57_vm1 = vcmask 293888   ;;  %vm116_vm2 = vcmask 195584  }
   0x8   :  { %457 = vset.pattern.permute.xlu2 %v545_v0  ;;  %54 = vperm.xlu0 %455, %v41_v1   ;;  %v39_v5 = vld [vmem:[%s690_s1] sm:$0xff]  ;;  %v40_v7 = vld [vmem:[%s690_s1 + $0x8] sm:$0xff]  ;;  %v411_v10 = vld [vmem:[%s690_s1 + $0x30] sm:$0xff]  ;;  %vm157_vm3 = vcmask 130048   ;;  %vm198_vm4 = vcmask 64512   ;;  %s391_s5 = sshll.u32 %s692_s3, 4  ;;  %s392_s5 = int_to_ptr.hbm [resolvable:$true] %s391_s5 }
   0x9   :  { %404 = vmatpush.msk.msra.mxu0 %vm67_vm0, %v35_v2  ;;  %44 = vperm.xlu1 %456, %v39_v5   ;;  %v31_v8 = vld [vmem:[#allocation2] sm:$0xff]  ;;  %v37_v12 = vld [vmem:[%s689_s0 + $0x8] sm:$0xff]  ;;  %v419_v13 = vld [vmem:[%s690_s1 + $0x78] sm:$0xff] }
   0xa   :  { %v36_v9 = vld [vmem:[%s689_s0] sm:$0xff]  ;;  %v427_v14 = vld [vmem:[%s690_s1 + $0xa8] sm:$0xff]  ;;  %v38_v15 = vld [vmem:[%s689_s0 + $0x10] sm:$0xff] }
   0xb   :  { %83 = vmatpush.msra.mxu0 %v34_v3  ;;  %v420_v11 = vld [vmem:[%s690_s1 + $0x80] sm:$0xff]  ;;  %v438_v17 = vld [vmem:[%s690_s1 + $0xd0] sm:$0xff]  ;;  %v439_v18 = vld [vmem:[%s690_s1 + $0xd8] sm:$0xff] }
   0xc   :  { %v426_v16 = vld [vmem:[%s690_s1 + $0xa0] sm:$0xff]  ;;  %v441_v19 = vld [vmem:[%s690_s1 + $0xe8] sm:$0xf]  ;;  %v415_v24 = vld [vmem:[%s690_s1 + $0x50] sm:$0xff] }
   0xd   :  { %84 = vmatpush.msra.mxu0 %v33_v4  ;;  %v410_v22 = vld [vmem:[%s690_s1 + $0x28] sm:$0xff]  ;;  %v428_v31 = vld [vmem:[%s690_s1 + $0xb0] sm:$0xff]  ;;  %v440_v38 = vld [vmem:[%s690_s1 + $0xe0] sm:$0xff] }
   0xe   :  { %108 = vperm.xlu2 %457, %v410_v22   ;;  %v408_v34 = vld [vmem:[%s689_s0 + $0x28] sm:$0xff]  ;;  %v409_v37 = vld [vmem:[%s689_s0 + $0x30] sm:$0xff]  ;;  %v417_v51 = vld [vmem:[%s689_s0 + $0x78] sm:$0xff] }
   0xf   :  { %85 = vmatpush.msra.mxu0 %v32_v6  ;;  %v437_v36 = vld [vmem:[%s690_s1 + $0xc8] sm:$0xff]  ;;  %v414_v46 = vld [vmem:[%s689_s0 + $0x50] sm:$0xff]  ;;  %v418_v53 = vld [vmem:[%s689_s0 + $0x80] sm:$0xff] }
  0x10   :  { %49 = vperm.xlu0 %455, %v40_v7   ;;  %v423_v61 = vld [vmem:[%s689_s0 + $0xa0] sm:$0xff]  ;;  %v424_v63 = vld [vmem:[%s689_s0 + $0xa8] sm:$0xff]  ;;  %v425_v0 = vld [vmem:[%s689_s0 + $0xb0] sm:$0xff] }
  0x11   :  { %86 = vmatpush.msra.mxu0 %v31_v8  ;;  %113 = vperm.xlu1 %456, %v411_v10  }
  0x12   :  { %405 = vmatmul.msk.f32.vlgmr.msra.gmra.mxu0 %vm57_vm1, %v36_v9 }
  0x16   :  { %154 = vperm.xlu2 %457, %v415_v24  }
  0x18   :  { %195 = vperm.xlu0 %455, %v420_v11  }
  0x19   :  { %190 = vperm.xlu1 %456, %v419_v13   ;;  %v434_v13 = vld [vmem:[%s689_s0 + $0xd8] sm:$0xff] }
  0x1a   :  { %406 = vmatmul.msk.f32.gmra.mxu0 %vm57_vm1, %v37_v12  ;;  %v432_v12 = vld [vmem:[%s689_s0 + $0xc8] sm:$0xff] }
  0x1e   :  { %250 = vperm.xlu2 %457, %v428_v31  }
  0x20   :  { %245 = vperm.xlu0 %455, %v427_v14  }
  0x21   :  { %240 = vperm.xlu1 %456, %v426_v16   ;;  %v435_v16 = vld [vmem:[%s689_s0 + $0xe0] sm:$0xff] }
  0x22   :  { %407 = vmatmul.msk.f32.gmra.mxu0 %vm57_vm1, %v38_v15  ;;  %v433_v15 = vld [vmem:[%s689_s0 + $0xd0] sm:$0xff] }
  0x26   :  { %305 = vperm.xlu2 %457, %v437_v36  }
  0x28   :  { %310 = vperm.xlu0 %455, %v438_v17   ;;  %v436_v17 = vld [vmem:[%s689_s0 + $0xe8] sm:$0xf]  ;;  %s546_s0 = smov [#allocation5]  }
  0x29   :  { %315 = vperm.xlu1 %456, %v439_v18   ;;  %s389_s29 = sshll.u32 %s546_s0, 4  ;;  %s390_s29 = int_to_ptr.vmem [resolvable:$true] %s389_s29 }
  0x2e   :  { %320 = vperm.xlu2 %457, %v440_v38  }
  0x30   :  { %325 = vperm.xlu0 %455, %v441_v19  }
  0x68   :  { %v109_v41 = vpop.permute.xlu2 %108 }
  0x70   :  { %v155_v48 = vpop.permute.xlu2 %154 }
  0x78   :  { %v251_v4 = vpop.permute.xlu2 %250 }
  0x7a   :  { %v55_v21 = vpop.permute.xlu0 %54 }
  0x7b   :  { %v45_v29 = vpop.permute.xlu1 %44 }
  0x80   :  { %v306_v18 = vpop.permute.xlu2 %305 }
  0x82   :  { %v50_v25 = vpop.permute.xlu0 %49 }
  0x83   :  { %v114_v40 = vpop.permute.xlu1 %113 }
  0x8a   :  { %v196_v55 = vpop.permute.xlu0 %195 }
  0x8b   :  { %v191_v56 = vpop.permute.xlu1 %190 }
  0x8f   :  { %v88_v20 = vpop.f32.mrf.mxu0 }
  0x90   :  { %v89_v30 = vadd.f32 %v88_v20, %v45_v29 }
  0x92   :  { %v246_v3 = vpop.permute.xlu0 %245 }
  0x93   :  { %v241_v8 = vpop.permute.xlu1 %240 }
  0x97   :  { %v91_v23 = vpop.f32.mrf.mxu0 }
  0x98   :  { %v92_v27 = vadd.f32 %v91_v23, %v50_v25 }
  0x9a   :  { %v311_v24 = vpop.permute.xlu0 %310 }
  0x9f   :  { %v94_v26 = vpop.f32.mrf.mxu0 }
  0xa0   :  { %v95_v28 = vadd.f32 %v94_v26, %v55_v21  ;;  %v316_v21 = vpop.permute.xlu1 %315 }
  0xa2   :  { %458 = vtanh.f32 %v95_v28  ;;  %v321_v28 = vpop.permute.xlu2 %320 }
  0xa3   :  { %460 = vtanh.f32 %v92_v27 }
  0xa4   :  { %462 = vtanh.f32 %v89_v30 }
  0xa8   :  { %v459_v32 = vpop.eup %458 }
  0xa9   :  { %136 = vmatpush.msra.mxu1 %v459_v32  ;;  %v461_v33 = vpop.eup %460 }
  0xaa   :  { %v463_v35 = vpop.eup %462 }
  0xab   :  { %137 = vmatpush.msra.mxu1 %v461_v33  ;;  %v326_v33 = vpop.permute.xlu0 %325 }
  0xad   :  { %138 = vmatpush.msra.mxu1 %v463_v35 }
  0xae   :  { %412 = vmatmul.msk.f32.vlgmr.msra.gmra.mxu1 %vm116_vm2, %v408_v34 }
  0xb6   :  { %413 = vmatmul.msk.f32.gmra.mxu1 %vm116_vm2, %v409_v37 }
 0x12b   :  { %v140_v39 = vpop.f32.mrf.mxu1 }
 0x12c   :  { %v141_v43 = vadd.f32 %v140_v39, %v109_v41 }
 0x133   :  { %v143_v42 = vpop.f32.mrf.mxu1 }
 0x134   :  { %v144_v44 = vadd.f32 %v143_v42, %v114_v40 }
 0x136   :  { %464 = vtanh.f32 %v144_v44 }
 0x137   :  { %466 = vtanh.f32 %v141_v43 }
 0x13c   :  { %v465_v45 = vpop.eup %464 }
 0x13d   :  { %175 = vmatpush.msra.mxu2 %v465_v45  ;;  %v467_v47 = vpop.eup %466 }
 0x13f   :  { %176 = vmatpush.msra.mxu2 %v467_v47 }
 0x140   :  { %416 = vmatmul.msk.f32.vlgmr.msra.gmra.mxu2 %vm157_vm3, %v414_v46 }
 0x1c3   :  { %v178_v49 = vpop.f32.mrf.mxu2 }
 0x1c4   :  { %v179_v50 = vadd.f32 %v178_v49, %v155_v48 }
 0x1c6   :  { %468 = vtanh.f32 %v179_v50 }
 0x1cc   :  { %v469_v52 = vpop.eup %468 }
 0x1cd   :  { %220 = vmatpush.msra.mxu3 %v469_v52 }
 0x1ce   :  { %421 = vmatmul.msk.f32.vlgmr.msra.gmra.mxu3 %vm198_vm4, %v417_v51 }
 0x1d6   :  { %422 = vmatmul.msk.f32.gmra.mxu3 %vm198_vm4, %v418_v53 }
 0x251   :  { %v222_v54 = vpop.f32.mrf.mxu3 }
 0x252   :  { %v223_v58 = vadd.f32 %v222_v54, %v191_v56 }
 0x259   :  { %v225_v57 = vpop.f32.mrf.mxu3 }
 0x25a   :  { %v226_v59 = vadd.f32 %v225_v57, %v196_v55 }
 0x25c   :  { %470 = vtanh.f32 %v226_v59 }
 0x25d   :  { %472 = vtanh.f32 %v223_v58 }
 0x262   :  { %v471_v60 = vpop.eup %470 }
 0x263   :  { %276 = vmatpush.msrb.mxu2 %v471_v60  ;;  %v473_v62 = vpop.eup %472 }
 0x265   :  { %277 = vmatpush.msrb.mxu2 %v473_v62 }
 0x266   :  { %429 = vmatmul.msk.f32.vlgmr.msrb.gmra.mxu2 %vm157_vm3, %v423_v61 }
 0x26e   :  { %430 = vmatmul.msk.f32.gmra.mxu2 %vm157_vm3, %v424_v63 }
 0x276   :  { %431 = vmatmul.msk.f32.gmra.mxu2 %vm157_vm3, %v425_v0 }
 0x2e9   :  { %v279_v1 = vpop.f32.mrf.mxu2 }
 0x2ea   :  { %v280_v9 = vadd.f32 %v279_v1, %v241_v8 }
 0x2f1   :  { %v282_v2 = vpop.f32.mrf.mxu2 }
 0x2f2   :  { %v283_v6 = vadd.f32 %v282_v2, %v246_v3 }
 0x2f9   :  { %v285_v5 = vpop.f32.mrf.mxu2 }
 0x2fa   :  { %v286_v7 = vadd.f32 %v285_v5, %v251_v4 }
 0x2fc   :  { %474 = vtanh.f32 %v286_v7 }
 0x2fd   :  { %476 = vtanh.f32 %v283_v6 }
 0x2fe   :  { %478 = vtanh.f32 %v280_v9 }
 0x302   :  { %v475_v10 = vpop.eup %474 }
 0x303   :  { %356 = vmatpush.msrb.mxu1 %v475_v10  ;;  %447 = vmatpush.msrb.mxu3 %v475_v10  ;;  %v477_v11 = vpop.eup %476 }
 0x304   :  { %v479_v14 = vpop.eup %478 }
 0x305   :  { %357 = vmatpush.msrb.mxu1 %v477_v11  ;;  %448 = vmatpush.msrb.mxu3 %v477_v11 }
 0x307   :  { %358 = vmatpush.msrb.mxu1 %v479_v14  ;;  %449 = vmatpush.msrb.mxu3 %v479_v14 }
 0x308   :  { %442 = vmatmul.msk.f32.vlgmr.msrb.gmra.mxu1 %vm116_vm2, %v432_v12  ;;  %444 = vmatmul.msk.f32.vlgmr.msrb.gmra.mxu3 %vm116_vm2, %v434_v13 }
 0x310   :  { %443 = vmatmul.msk.f32.gmra.mxu1 %vm116_vm2, %v433_v15  ;;  %445 = vmatmul.msk.f32.gmra.mxu3 %vm116_vm2, %v435_v16 }
 0x318   :  { %446 = vmatmul.msk.f32.gmra.mxu3 %vm116_vm2, %v436_v17 }
 0x385   :  { %v360_v19 = vpop.f32.mrf.mxu1 }
 0x386   :  { %v361_v20 = vadd.f32 %v360_v19, %v306_v18 }
 0x388   :  { %480 = vtanh.f32 %v361_v20 }
 0x38b   :  { %v366_v22 = vpop.f32.mrf.mxu3 }
 0x38c   :  { %v367_v23 = vadd.f32 %v366_v22, %v316_v21 }
 0x38d   :  { %v363_v25 = vpop.f32.mrf.mxu1 }
 0x38e   :  { %v481_v26 = vpop.eup %480  ;;  %482 = vtanh.f32 %v367_v23  ;;  %v364_v27 = vadd.f32 %v363_v25, %v311_v24 }
 0x38f   :  { %380 = vst [vmem:[#allocation5] sm:$0xff] %v481_v26 }
 0x390   :  { %484 = vtanh.f32 %v364_v27 }
 0x393   :  { %v369_v29 = vpop.f32.mrf.mxu3 }
 0x394   :  { %v483_v30 = vpop.eup %482  ;;  %v370_v31 = vadd.f32 %v369_v29, %v321_v28 }
 0x395   :  { %382 = vst [vmem:[#allocation5 + $0x10] sm:$0xff] %v483_v30 }
 0x396   :  { %v485_v32 = vpop.eup %484  ;;  %486 = vtanh.f32 %v370_v31 }
 0x397   :  { %381 = vst [vmem:[#allocation5 + $0x8] sm:$0xff] %v485_v32 }
 0x39b   :  { %v372_v34 = vpop.f32.mrf.mxu3 }
 0x39c   :  { %v487_v35 = vpop.eup %486  ;;  %v373_v36 = vadd.f32 %v372_v34, %v326_v33 }
 0x39d   :  { %383 = vst [vmem:[#allocation5 + $0x18] sm:$0xff] %v487_v35 }
 0x39e   :  { %488 = vtanh.f32 %v373_v36 }
 0x3a4   :  { %v489_v37 = vpop.eup %488 }
 0x3a5   :  { %384 = vst [vmem:[#allocation5 + $0x20] sm:$0xf] %v489_v37 }
 0x3a6   :  { %397 = dma.vmem_to_hbm [thread:$0]  %s390_s29, 640, %s392_s5, [#allocation4], %s543_s17, %s543_s17, %s544_s18  }
 0x3a7   :  { %540 = dma.done.wait [#allocation4], 640  }
 0x3a8   :  { %541 = vsyncadd [#allocation4], 4294966656 }
 0x3a9   :  { %402 = vsyncpa [#allocation3], 1 }
 0x3aa   :  { %403 = vsyncpa [#allocation4], 1 }

</bundles_post_ra>
